<compile_context>
chip_gen: v7x
topology: tpu7x:2x2x1
jax: 0.10.0
libtpu: 0.0.40
codegen_flags: <defaults>
</compile_context>

<pallas_src>
import functools
import itertools

import jax
import jax.numpy as jnp
from jax import lax
from jax.experimental import pallas as pl
from jax.experimental.pallas import tpu as pltpu


_UNROLL_THRESHOLD = 8  # outer-runs per tile above which we switch to fori_loop


def _divisors(n):
    out = set()
    d = 1
    while d * d <= n:
        if n % d == 0:
            out.add(d)
            out.add(n // d)
        d += 1
    return sorted(out)


def _make_kernel(dim, N, Ck, perms, outers_per_tile, num_row_tiles):
    """x_ref: (tb, N**dim, Ck) ; o_ref: (tb, outers_per_tile*N, len(perms)*Ck)."""
    n_perm = len(perms)
    # Static per-permutation index constants (row-major object-axis math).
    stride_in = [N ** (dim - 1 - p[dim - 1]) for p in perms]
    weight = [[N ** (dim - 1 - p[m]) for m in range(dim - 1)] for p in perms]
    place = [N ** (dim - 2 - m) for m in range(dim - 1)]

    def gather_wide(x_ref, outer):
        """All-permutation rows for one output run: (tb, N, n_perm*Ck)."""
        parts = []
        for pi in range(n_perm):
            base = 0
            for m in range(dim - 1):
                digit = (outer // place[m]) % N
                base = base + digit * weight[pi][m]
            s = stride_in[pi]
            if s == 1:
                parts.append(x_ref[:, pl.ds(base, N), :])
            else:
                parts.append(x_ref[:, pl.ds(base, N, stride=s), :])
        # One full-lane-width slab per output run (single wide store later).
        return parts[0] if n_perm == 1 else jnp.concatenate(parts, axis=-1)

    def kernel(x_ref, o_ref):
        # Absolute "outer" index of the first output run of this row tile.
        if num_row_tiles == 1:
            outer_base = 0  # fully static addressing
        else:
            outer_base = pl.program_id(1) * outers_per_tile

        if outers_per_tile <= _UNROLL_THRESHOLD:
            # Small tiles: static Python unroll (store offsets are literals).
            for lo in range(outers_per_tile):
                o_ref[:, pl.ds(lo * N, N), :] = gather_wide(x_ref, outer_base + lo)
        else:
            # Bounded code size: fori_loop, manually unrolled by `u` outer
            # runs per body so each store is one wide sublane-aligned slab.
            cands = [c for c in range(min(8, outers_per_tile), 0, -1)
                     if outers_per_tile % c == 0]
            aligned = [c for c in cands if (c * N) % 8 == 0]
            u = aligned[0] if aligned else cands[0]

            def body(step, carry):
                first = outer_base + step * u
                chunks = [gather_wide(x_ref, first + j) for j in range(u)]
                slab = chunks[0] if u == 1 else jnp.concatenate(chunks, axis=1)
                start = pl.multiple_of(step * (u * N), u * N)
                o_ref[:, pl.ds(start, u * N), :] = slab
                return carry

            lax.fori_loop(0, outers_per_tile // u, body, 0)

    return kernel


@functools.partial(jax.jit, static_argnums=(1,),
                   static_argnames=("block_bytes_target",))
def sparse_permutation(x, dim, *, block_bytes_target=8 * 1024 * 1024):
    """x: [B, N,...,N (dim times), C] channel-last -> [B, N,...,N, C*dim!]."""
    if dim <= 1:
        return x

    B = x.shape[0]
    C = x.shape[-1]
    spatial = x.shape[1:-1]
    assert len(spatial) == dim, "input rank must be 1 + dim + 1"
    N = spatial[0]
    assert all(s == N for s in spatial), "object axes must have equal size"

    perms = list(itertools.permutations(range(dim)))  # identity first
    n_perm = len(perms)
    M = N ** dim

    orig_dtype = x.dtype
    itemsize = jnp.dtype(orig_dtype).itemsize

    # --- Sub-32-bit channel packing: 2xbf16 / 4xint8 -> one u32 lane ---------
    pack_ratio = 1
    if itemsize < 4 and (C * itemsize) % 4 == 0:
        pack_ratio = 4 // itemsize
    if pack_ratio > 1:
        Ck = C // pack_ratio
        x_flat = jax.lax.bitcast_convert_type(
            x.reshape(B, M, Ck, pack_ratio), jnp.uint32)       # (B, M, Ck) u32
        work_dtype = jnp.uint32
        work_itemsize = 4
    else:
        Ck = C
        x_flat = x.reshape(B, M, C)                            # free reshape
        work_dtype = orig_dtype
        work_itemsize = itemsize

    # --- Batch tiling (amortize per-step overhead, keep >=2 steps for v7x) --
    in_batch_bytes = M * Ck * work_itemsize
    out_batch_bytes = n_perm * in_batch_bytes
    per_batch_bytes = in_batch_bytes + out_batch_bytes

    tb = max(1, block_bytes_target // per_batch_bytes)
    tb = min(tb, B)
    if B >= 2:
        tb = min(tb, (B + 1) // 2)        # >= 2 grid steps -> both v7x TCs busy
    grid_b = pl.cdiv(B, tb)               # no B % tb requirement

    # --- Output row tiling (v7x 64 MiB VMEM fit for big single-batch slabs) -
    outers_total = N ** (dim - 1)
    outers_per_tile = outers_total
    sublane = 8 * (4 // work_itemsize)     # 8 (32-bit), 16 (bf16), 32 (int8)
    if tb == 1 and per_batch_bytes > block_bytes_target:
        per_outer_out_bytes = N * n_perm * Ck * work_itemsize
        valid = [d for d in _divisors(outers_total)
                 if d == outers_total or (d * N) % sublane == 0]
        fitting = [d for d in valid
                   if in_batch_bytes + d * per_outer_out_bytes <= block_bytes_target]
        outers_per_tile = max(fitting) if fitting else min(valid)
    num_row_tiles = outers_total // outers_per_tile
    rows_per_tile = outers_per_tile * N

    kernel = _make_kernel(dim, N, Ck, perms, outers_per_tile, num_row_tiles)

    # Explicit VMEM budget: BlockSpec double-buffers both operands.
    in_block_bytes = tb * M * Ck * work_itemsize
    out_block_bytes = tb * rows_per_tile * n_perm * Ck * work_itemsize
    vmem_limit = min(
        max(2 * (in_block_bytes + out_block_bytes) + (2 << 20), 32 << 20),
        128 << 20)

    out_flat = pl.pallas_call(
        kernel,
        out_shape=jax.ShapeDtypeStruct((B, M, n_perm * Ck), work_dtype),
        grid=(grid_b, num_row_tiles),
        # Input slab covers all rows and stays resident across row tiles
        # (constant block index along the inner grid axis -> no re-DMA).
        in_specs=[pl.BlockSpec((tb, M, Ck), lambda b, r: (b, 0, 0))],
        out_specs=pl.BlockSpec((tb, rows_per_tile, n_perm * Ck),
                               lambda b, r: (b, r, 0)),
        compiler_params=pltpu.CompilerParams(
            dimension_semantics=("parallel", "parallel"),
            vmem_limit_bytes=vmem_limit),
        cost_estimate=pl.CostEstimate(
            flops=0, transcendentals=0,
            bytes_accessed=(1 + n_perm) * B * M * C * itemsize),
    )(x_flat)

    if pack_ratio > 1:
        out_flat = jax.lax.bitcast_convert_type(out_flat, orig_dtype)
        out_flat = out_flat.reshape(B, M, n_perm * C)

    # Free reshape back to the channel-last NLM convention.
    return out_flat.reshape((B,) + spatial + (n_perm * C,))


def sparse_permutation_ref(x, dim):
    """Pure-JAX reference mirroring the dense NLM Permutation semantics."""
    if dim <= 1:
        return x
    nd = x.ndim
    res = []
    for p in itertools.permutations(range(dim)):
        axes = (0,) + tuple(1 + a for a in p) + (nd - 1,)
        res.append(jnp.transpose(x, axes))
    return jnp.concatenate(res, axis=-1)


if __name__ == "__main__":
    key = jax.random.PRNGKey(0)
    k1, k2, k3, k4 = jax.random.split(key, 4)

    # r = 2 arity: [B, N, N, C] -> [B, N, N, 2C]  (static unrolled path)
    B, N, C = 2, 8, 4
    x2 = jax.random.normal(k1, (B, N, N, C), dtype=jnp.float32)
    out2 = jax.block_until_ready(sparse_permutation(x2, 2))
    ref2 = sparse_permutation_ref(x2, 2)
    assert out2.shape == (B, N, N, 2 * C), out2.shape
    assert jnp.array_equal(out2, ref2), "dim=2 mismatch vs reference"

    # r = 3 arity (exercises the fori_loop + wide aligned-slab store path)
    x3 = jax.random.normal(k2, (2, 4, 4, 4, 2), dtype=jnp.float32)
    out3 = jax.block_until_ready(sparse_permutation(x3, 3))
    ref3 = sparse_permutation_ref(x3, 3)
    assert out3.shape == (2, 4, 4, 4, 12), out3.shape
    assert jnp.array_equal(out3, ref3), "dim=3 mismatch vs reference"

    # Non-dividing batch (cdiv grid, partial last batch block)
    x2n = jax.random.normal(k3, (3, N, N, C), dtype=jnp.float32)
    out2n = jax.block_until_ready(sparse_permutation(x2n, 2))
    assert jnp.array_equal(out2n, sparse_permutation_ref(x2n, 2)), "cdiv path mismatch"

    # Forced output-row tiling (the v7x VMEM-fit path) on a small shape.
    out2t = jax.block_until_ready(sparse_permutation(x2, 2, block_bytes_target=2048))
    assert jnp.array_equal(out2t, ref2), "row-tiled path mismatch"

    # bf16 packed-lane path (2 x bf16 -> u32 channel packing).
    x2h = x2.astype(jnp.bfloat16)
    out2h = jax.block_until_ready(sparse_permutation(x2h, 2))
    assert jnp.array_equal(out2h, sparse_permutation_ref(x2h, 2)), "bf16 pack mismatch"

    # dim <= 1 passthrough
    x1 = jax.random.normal(k4, (B, N, C), dtype=jnp.float32)
    out1 = jax.block_until_ready(sparse_permutation(x1, 1))
    assert jnp.array_equal(out1, x1)

    print("KERNEL_OK")
</pallas_src>

<mosaic_0001>
module attributes {stable_mosaic.version = 11 : i64} {
  func.func @kernel(%arg0: i32, %arg1: i32, %arg2: memref<1x64x4xf32, #tpu.memory_space<vmem>>, %arg3: memref<1x64x8xf32, #tpu.memory_space<vmem>>) attributes {dimension_semantics = [#tpu.dimension_semantics<parallel>, #tpu.dimension_semantics<parallel>], iteration_bounds = array<i64: 2, 1>, scalar_prefetch = 0 : i64, scratch_operands = 0 : i64, tpu.core_type = #tpu.core_type<tc>, window_params = [{transform_indices = @transform_0, window_bounds = array<i64: 1, 64, 4>}, {transform_indices = @transform_1, window_bounds = array<i64: 1, 64, 8>}]} {
    %c0 = arith.constant 0 : index
    %c0_0 = arith.constant 0 : index
    %c0_1 = arith.constant 0 : index
    %0 = vector.load %arg2[%c0, %c0_0, %c0_1] : memref<1x64x4xf32, #tpu.memory_space<vmem>>, vector<1x8x4xf32>
    %c0_2 = arith.constant 0 : index
    %c0_3 = arith.constant 0 : index
    %c0_4 = arith.constant 0 : index
    %1 = tpu.strided_load %arg2[%c0_2, %c0_3, %c0_4] {strides = array<i32: 1, 8, 1>} : memref<1x64x4xf32, #tpu.memory_space<vmem>>, vector<1x8x4xf32>
    %2 = tpu.concatenate %0, %1 in 2 : vector<1x8x4xf32>, vector<1x8x4xf32> -> vector<1x8x8xf32>
    %c0_5 = arith.constant 0 : index
    %c0_6 = arith.constant 0 : index
    %c0_7 = arith.constant 0 : index
    %3 = vector.load %arg3[%c0_5, %c0_6, %c0_7] : memref<1x64x8xf32, #tpu.memory_space<vmem>>, vector<1x8x8xf32>
    tpu.vector_store %arg3[%c0_5, %c0_6, %c0_7], %2 {strides = array<i32>} : memref<1x64x8xf32, #tpu.memory_space<vmem>>, vector<1x8x8xf32>,
    %c0_8 = arith.constant 0 : index
    %c8 = arith.constant 8 : index
    %c0_9 = arith.constant 0 : index
    %4 = vector.load %arg2[%c0_8, %c8, %c0_9] : memref<1x64x4xf32, #tpu.memory_space<vmem>>, vector<1x8x4xf32>
    %c0_10 = arith.constant 0 : index
    %c1 = arith.constant 1 : index
    %c0_11 = arith.constant 0 : index
    %5 = tpu.strided_load %arg2[%c0_10, %c1, %c0_11] {strides = array<i32: 1, 8, 1>} : memref<1x64x4xf32, #tpu.memory_space<vmem>>, vector<1x8x4xf32>
    %6 = tpu.concatenate %4, %5 in 2 : vector<1x8x4xf32>, vector<1x8x4xf32> -> vector<1x8x8xf32>
    %c0_12 = arith.constant 0 : index
    %c8_13 = arith.constant 8 : index
    %c0_14 = arith.constant 0 : index
    %7 = vector.load %arg3[%c0_12, %c8_13, %c0_14] : memref<1x64x8xf32, #tpu.memory_space<vmem>>, vector<1x8x8xf32>
    tpu.vector_store %arg3[%c0_12, %c8_13, %c0_14], %6 {strides = array<i32>} : memref<1x64x8xf32, #tpu.memory_space<vmem>>, vector<1x8x8xf32>,
    %c0_15 = arith.constant 0 : index
    %c16 = arith.constant 16 : index
    %c0_16 = arith.constant 0 : index
    %8 = vector.load %arg2[%c0_15, %c16, %c0_16] : memref<1x64x4xf32, #tpu.memory_space<vmem>>, vector<1x8x4xf32>
    %c0_17 = arith.constant 0 : index
    %c2 = arith.constant 2 : index
    %c0_18 = arith.constant 0 : index
    %9 = tpu.strided_load %arg2[%c0_17, %c2, %c0_18] {strides = array<i32: 1, 8, 1>} : memref<1x64x4xf32, #tpu.memory_space<vmem>>, vector<1x8x4xf32>
    %10 = tpu.concatenate %8, %9 in 2 : vector<1x8x4xf32>, vector<1x8x4xf32> -> vector<1x8x8xf32>
    %c0_19 = arith.constant 0 : index
    %c16_20 = arith.constant 16 : index
    %c0_21 = arith.constant 0 : index
    %11 = vector.load %arg3[%c0_19, %c16_20, %c0_21] : memref<1x64x8xf32, #tpu.memory_space<vmem>>, vector<1x8x8xf32>
    tpu.vector_store %arg3[%c0_19, %c16_20, %c0_21], %10 {strides = array<i32>} : memref<1x64x8xf32, #tpu.memory_space<vmem>>, vector<1x8x8xf32>,
    %c0_22 = arith.constant 0 : index
    %c24 = arith.constant 24 : index
    %c0_23 = arith.constant 0 : index
    %12 = vector.load %arg2[%c0_22, %c24, %c0_23] : memref<1x64x4xf32, #tpu.memory_space<vmem>>, vector<1x8x4xf32>
    %c0_24 = arith.constant 0 : index
    %c3 = arith.constant 3 : index
    %c0_25 = arith.constant 0 : index
    %13 = tpu.strided_load %arg2[%c0_24, %c3, %c0_25] {strides = array<i32: 1, 8, 1>} : memref<1x64x4xf32, #tpu.memory_space<vmem>>, vector<1x8x4xf32>
    %14 = tpu.concatenate %12, %13 in 2 : vector<1x8x4xf32>, vector<1x8x4xf32> -> vector<1x8x8xf32>
    %c0_26 = arith.constant 0 : index
    %c24_27 = arith.constant 24 : index
    %c0_28 = arith.constant 0 : index
    %15 = vector.load %arg3[%c0_26, %c24_27, %c0_28] : memref<1x64x8xf32, #tpu.memory_space<vmem>>, vector<1x8x8xf32>
    tpu.vector_store %arg3[%c0_26, %c24_27, %c0_28], %14 {strides = array<i32>} : memref<1x64x8xf32, #tpu.memory_space<vmem>>, vector<1x8x8xf32>,
    %c0_29 = arith.constant 0 : index
    %c32 = arith.constant 32 : index
    %c0_30 = arith.constant 0 : index
    %16 = vector.load %arg2[%c0_29, %c32, %c0_30] : memref<1x64x4xf32, #tpu.memory_space<vmem>>, vector<1x8x4xf32>
    %c0_31 = arith.constant 0 : index
    %c4 = arith.constant 4 : index
    %c0_32 = arith.constant 0 : index
    %17 = tpu.strided_load %arg2[%c0_31, %c4, %c0_32] {strides = array<i32: 1, 8, 1>} : memref<1x64x4xf32, #tpu.memory_space<vmem>>, vector<1x8x4xf32>
    %18 = tpu.concatenate %16, %17 in 2 : vector<1x8x4xf32>, vector<1x8x4xf32> -> vector<1x8x8xf32>
    %c0_33 = arith.constant 0 : index
    %c32_34 = arith.constant 32 : index
    %c0_35 = arith.constant 0 : index
    %19 = vector.load %arg3[%c0_33, %c32_34, %c0_35] : memref<1x64x8xf32, #tpu.memory_space<vmem>>, vector<1x8x8xf32>
    tpu.vector_store %arg3[%c0_33, %c32_34, %c0_35], %18 {strides = array<i32>} : memref<1x64x8xf32, #tpu.memory_space<vmem>>, vector<1x8x8xf32>,
    %c0_36 = arith.constant 0 : index
    %c40 = arith.constant 40 : index
    %c0_37 = arith.constant 0 : index
    %20 = vector.load %arg2[%c0_36, %c40, %c0_37] : memref<1x64x4xf32, #tpu.memory_space<vmem>>, vector<1x8x4xf32>
    %c0_38 = arith.constant 0 : index
    %c5 = arith.constant 5 : index
    %c0_39 = arith.constant 0 : index
    %21 = tpu.strided_load %arg2[%c0_38, %c5, %c0_39] {strides = array<i32: 1, 8, 1>} : memref<1x64x4xf32, #tpu.memory_space<vmem>>, vector<1x8x4xf32>
    %22 = tpu.concatenate %20, %21 in 2 : vector<1x8x4xf32>, vector<1x8x4xf32> -> vector<1x8x8xf32>
    %c0_40 = arith.constant 0 : index
    %c40_41 = arith.constant 40 : index
    %c0_42 = arith.constant 0 : index
    %23 = vector.load %arg3[%c0_40, %c40_41, %c0_42] : memref<1x64x8xf32, #tpu.memory_space<vmem>>, vector<1x8x8xf32>
    tpu.vector_store %arg3[%c0_40, %c40_41, %c0_42], %22 {strides = array<i32>} : memref<1x64x8xf32, #tpu.memory_space<vmem>>, vector<1x8x8xf32>,
    %c0_43 = arith.constant 0 : index
    %c48 = arith.constant 48 : index
    %c0_44 = arith.constant 0 : index
    %24 = vector.load %arg2[%c0_43, %c48, %c0_44] : memref<1x64x4xf32, #tpu.memory_space<vmem>>, vector<1x8x4xf32>
    %c0_45 = arith.constant 0 : index
    %c6 = arith.constant 6 : index
    %c0_46 = arith.constant 0 : index
    %25 = tpu.strided_load %arg2[%c0_45, %c6, %c0_46] {strides = array<i32: 1, 8, 1>} : memref<1x64x4xf32, #tpu.memory_space<vmem>>, vector<1x8x4xf32>
    %26 = tpu.concatenate %24, %25 in 2 : vector<1x8x4xf32>, vector<1x8x4xf32> -> vector<1x8x8xf32>
    %c0_47 = arith.constant 0 : index
    %c48_48 = arith.constant 48 : index
    %c0_49 = arith.constant 0 : index
    %27 = vector.load %arg3[%c0_47, %c48_48, %c0_49] : memref<1x64x8xf32, #tpu.memory_space<vmem>>, vector<1x8x8xf32>
    tpu.vector_store %arg3[%c0_47, %c48_48, %c0_49], %26 {strides = array<i32>} : memref<1x64x8xf32, #tpu.memory_space<vmem>>, vector<1x8x8xf32>,
    %c0_50 = arith.constant 0 : index
    %c56 = arith.constant 56 : index
    %c0_51 = arith.constant 0 : index
    %28 = vector.load %arg2[%c0_50, %c56, %c0_51] : memref<1x64x4xf32, #tpu.memory_space<vmem>>, vector<1x8x4xf32>
    %c0_52 = arith.constant 0 : index
    %c7 = arith.constant 7 : index
    %c0_53 = arith.constant 0 : index
    %29 = tpu.strided_load %arg2[%c0_52, %c7, %c0_53] {strides = array<i32: 1, 8, 1>} : memref<1x64x4xf32, #tpu.memory_space<vmem>>, vector<1x8x4xf32>
    %30 = tpu.concatenate %28, %29 in 2 : vector<1x8x4xf32>, vector<1x8x4xf32> -> vector<1x8x8xf32>
    %c0_54 = arith.constant 0 : index
    %c56_55 = arith.constant 56 : index
    %c0_56 = arith.constant 0 : index
    %31 = vector.load %arg3[%c0_54, %c56_55, %c0_56] : memref<1x64x8xf32, #tpu.memory_space<vmem>>, vector<1x8x8xf32>
    tpu.vector_store %arg3[%c0_54, %c56_55, %c0_56], %30 {strides = array<i32>} : memref<1x64x8xf32, #tpu.memory_space<vmem>>, vector<1x8x8xf32>,
    return
  }
  func.func @transform_0(%arg0: i32, %arg1: i32) -> (i32, i32, i32) {
    %c0_i32 = arith.constant 0 : i32
    %c0_i32_0 = arith.constant 0 : i32
    %c0_i32_1 = arith.constant 0 : i32
    return %arg0, %c0_i32, %c0_i32_0 : i32, i32, i32
  }
  func.func @transform_1(%arg0: i32, %arg1: i32) -> (i32, i32, i32) {
    %c0_i32 = arith.constant 0 : i32
    %c0_i32_0 = arith.constant 0 : i32
    return %arg0, %arg1, %c0_i32 : i32, i32, i32
  }
}

</mosaic_0001>

<bundles_post_ra>
// kernel: sparse_permutation.1
= control target key start
LH: loop header
LB: loop body
LE: loop exit
PB: predicated region body
PF: predicated region fallthrough
CT: control target
= control target key end

     0   :  { %6 = vsyncpa [#allocation3], 0  ;;  %s661_s0 = inlined_call_operand.vmem [shape: f32[2,64,4], index: 0, kind: input, shape index: {}]   ;;  %s662_s1 = inlined_call_operand.hbm [shape: f32[2,64,8], index: 1, kind: output, shape index: {}]  }
   0x1   :  { %8 = vsyncpa [#allocation3 + $0x1], 0  ;;  %s489_s6 = smov 0   ;;  %s491_s7 = smov 0  }
   0x2   :  { %s493_s8 = smov 0   ;;  %s495_s9 = smov 0  }
   0x3   :  { %s497_s10 = smov 0   ;;  %s499_s11 = smov 0  }
   0x4 LB: > { %s308_s12 = sadd.s32 4294967295, %s473_s11   ;;  %s309_s13 = sadd.s32 4294967294, %s473_s11   ;;  %s473_s11 = sphi %s499_s11, %s14_s11   ;;  %s469_s10 = sphi %s497_s10, %s669_s10   ;;  %s465_s9 = sphi %s495_s9, %s668_s9   ;;  %s461_s8 = sphi %s493_s8, %s667_s8   ;;  %s457_s7 = sphi %s491_s7, %s666_s7   ;;  %s453_s6 = sphi %s489_s6, %s665_s6  }
   0x5   : > { %s26_s14 = sadd.s32 1, %s469_s10  ;;  %s61_s15 = sadd.s32 1, %s461_s8 }
   0x6   : > { %p28_p0 = scmp.ge.s32.totalorder %s26_s14, 2  ;;  %p71_p1 = scmp.ne.s32.totalorder %s461_s8, %s457_s7 }
   0x7   : > { %p72_p2 = scmp.eq.s32.totalorder %s308_s12, 1  ;;  %p77_p3 = scmp.ne.s32.totalorder %s457_s7, %s453_s6 }
   0x8   : > { %s671_s14 = smov (%p28_p0, %s26_s14), 0  ;;  %p78_p5 = scmp.eq.s32.totalorder %s309_s13, 1 }
   0x9   : > { %p529_p4 = por %p72_p2, %p71_p1  ;;  %s56_s17 = ssub.s32 %s469_s10, %s671_s14 }
   0xa   : > { %p312_p6 = scmp.ge.s32.totalorder %s473_s11, 1  ;;  %p59_p7 = scmp.eq.s32.totalorder %s56_s17, 0 }
   0xb   : > { %p536_p8 = por %p78_p5, %p77_p3  ;;  %p104_p9 = scmp.lt.s32.totalorder %s473_s11, 3 }
   0xc   : > { %s542_s19 = scalar_select %p59_p7, %s461_s8, %s61_s15  }
   0xd   : > { %p105_p10 = pnand %p312_p6, %p104_p9 }
   0xe   : > { %p124_p11 = scmp.lt.s32.totalorder (!%p105_p10), %s465_s9, 1  ;;  %s475_s25 = smov (!%p105_p10), 4   ;;  %vm138_vm0 = vcmask (!%p105_p10), 31744   ;;  %vm140_vm1 = vcmask (!%p105_p10), 64512  }
   0xf   : > { %108 = sbr.rel (%p105_p10) target bundleno = 173 (0xad), region = 24  ;;  %s121_s26 = sand.u32 (!%p105_p10), 1, %s457_s7  }
  0x10   : > { %s313_s27 = sshll.u32 (!%p105_p10), %s121_s26, 6  ;;  %s336_s29 = sshll.u32 (!%p105_p10), %s465_s9, 10 }
  0x11   : > { %s573_s28 = scalar_lea.vmem (!%p105_p10), [#allocation2], %s313_s27  ;;  %s603_s4 = scalar_lea.hbm (!%p105_p10), %s662_s1, %s336_s29 }
  0x12   : > { %s235_s30 = sshll.u32 (!%p105_p10), %s573_s28, 4  ;;  %s615_s5 = scalar_lea.sflag (!%p105_p10), [#allocation3], %s121_s26  ;;  %s605_s30 = int_to_ptr.vmem [resolvable:$true] %s235_s30 }
  0x13   : > { %s476_s12 = smov (!%p105_p10), [#allocation2]  }
  0x14   : > { %s399_s13 = sshll.u32 (!%p105_p10), %s476_s12, 4  ;;  %s400_s13 = int_to_ptr.vmem [resolvable:$false] %s399_s13 }
  0x15   : > { %s401_s15 = scalar_lea.vmem (!%p105_p10), %s400_s13, 2048  ;;  %p402_p1 = scmp.lt.s32.totalorder (!%p105_p10), %s605_s30, %s400_s13 }
  0x16   : > { %s125_s20 = scalar_select %p124_p11, %s465_s9, 1 }
  0x17   : > { %s395_s9 = scalar_lea.vmem %s605_s30, 1024 }
  0x18   : > { %s335_s21 = sshll.u32 %s125_s20, 6  ;;  %p396_p12 = scmp.ne.s32.totalorder %s605_s30, %s395_s9 }
  0x19   : > { %s549_s24 = scalar_lea.vmem %s661_s0, %s335_s21  ;;  %p403_p2 = scmp.lt.s32.totalorder %s401_s15, %s395_s9 }
  0x1a   : > { %v318_v0 = vld [vmem:[%s549_s24 + $0x2] ss:$8 sm:$0xf]  ;;  %v131_v3 = vld [vmem:[%s549_s24] ss:$8 sm:$0xf]  ;;  %p397_p13 = pnand %p396_p12, %p529_p4 }
  0x1b   : > { %v319_v1 = vld [vmem:[%s549_s24 + $0x2] ss:$8 sm:$0xf0]  ;;  %v132_v4 = vld [vmem:[%s549_s24] ss:$8 sm:$0xf0]  ;;  %p404_p3 = por %p403_p2, %p402_p1 }
  0x1c   : > { %v157_v2 = vor.u32 %v319_v1, %v318_v0  ;;  %v133_v5 = vor.u32 %v132_v4, %v131_v3  ;;  %v320_v6 = vld [vmem:[%s549_s24 + $0x3] ss:$8 sm:$0xf]  ;;  %v316_v9 = vld [vmem:[%s549_s24 + $0x1] ss:$8 sm:$0xf]  ;;  %p398_p0 = pneg %p397_p13 }
  0x1d   : > { %v321_v7 = vld [vmem:[%s549_s24 + $0x3] ss:$8 sm:$0xf0]  ;;  %v317_v10 = vld [vmem:[%s549_s24 + $0x1] ss:$8 sm:$0xf0] }
  0x1e   : > { %159 = vrot.lane.b32.xlu1 %v157_v2, %s475_s25  ;;  %v168_v8 = vor.u32 %v321_v7, %v320_v6  ;;  %135 = vrot.lane.b32.xlu0 %v133_v5, %s475_s25  ;;  %v146_v11 = vor.u32 %v317_v10, %v316_v9  ;;  %v324_v12 = vld [vmem:[%s549_s24 + $0x5] ss:$8 sm:$0xf]  ;;  %v322_v14 = vld [vmem:[%s549_s24 + $0x4] ss:$8 sm:$0xf]  ;;  %p405_p5 = pnand %p404_p3, %p398_p0 }
  0x1f   : > { %v325_v13 = vld [vmem:[%s549_s24 + $0x5] ss:$8 sm:$0xf0]  ;;  %v323_v15 = vld [vmem:[%s549_s24 + $0x4] ss:$8 sm:$0xf0] }
  0x20   : > { %v190_v16 = vor.u32 %v325_v13, %v324_v12  ;;  %v179_v17 = vor.u32 %v323_v15, %v322_v14  ;;  %v328_v18 = vld [vmem:[%s549_s24 + $0x7] ss:$8 sm:$0xf]  ;;  %v326_v20 = vld [vmem:[%s549_s24 + $0x6] ss:$8 sm:$0xf] }
  0x21   : > { %v329_v19 = vld [vmem:[%s549_s24 + $0x7] ss:$8 sm:$0xf0]  ;;  %v327_v21 = vld [vmem:[%s549_s24 + $0x6] ss:$8 sm:$0xf0] }
  0x22   : > { %170 = vrot.lane.b32.xlu1 %v168_v8, %s475_s25  ;;  %148 = vrot.lane.b32.xlu0 %v146_v11, %s475_s25  ;;  %v212_v22 = vor.u32 %v329_v19, %v328_v18  ;;  %v201_v23 = vor.u32 %v327_v21, %v326_v20  ;;  %v153_v24 = vld [vmem:[%s549_s24 + $0x10] sm:$0xff]  ;;  %v130_v25 = vld [vmem:[%s549_s24] sm:$0xff] }
  0x23   : > { %v164_v30 = vld [vmem:[%s549_s24 + $0x18] sm:$0xff]  ;;  %v142_v31 = vld [vmem:[%s549_s24 + $0x8] sm:$0xff]  ;;  %v175_v37 = vld [vmem:[%s549_s24 + $0x20] sm:$0xff] }
  0x24   : > { %v186_v36 = vld [vmem:[%s549_s24 + $0x28] sm:$0xff]  ;;  %v208_v42 = vld [vmem:[%s549_s24 + $0x38] sm:$0xff]  ;;  %v197_v43 = vld [vmem:[%s549_s24 + $0x30] sm:$0xff] }
  0x26   : > { %192 = vrot.lane.b32.xlu1 %v190_v16, %s475_s25  ;;  %181 = vrot.lane.b32.xlu0 %v179_v17, %s475_s25 }
  0x2a   : > { %214 = vrot.lane.b32.xlu1 %v212_v22, %s475_s25  ;;  %203 = vrot.lane.b32.xlu0 %v201_v23, %s475_s25 }
  0x90   : > { %v160_v26 = vpop.permute.xlu1 %159  ;;  %v136_v28 = vpop.permute.xlu0 %135 }
  0x91   : > { %v162_v27 = vsel %vm138_vm0, %v153_v24, %v160_v26  ;;  %v139_v29 = vsel %vm138_vm0, %v130_v25, %v136_v28 }
  0x92   : > { %163 = vst.msk [vmem:[%s573_s28 + $0x10] sm:$0xff] %vm140_vm1, %v162_v27  ;;  %141 = vst.msk [vmem:[%s573_s28] sm:$0xff] %vm140_vm1, %v139_v29 }
  0x94   : > { %v171_v32 = vpop.permute.xlu1 %170  ;;  %v149_v34 = vpop.permute.xlu0 %148 }
  0x95   : > { %v173_v33 = vsel %vm138_vm0, %v164_v30, %v171_v32  ;;  %v151_v35 = vsel %vm138_vm0, %v142_v31, %v149_v34 }
  0x96   : > { %174 = vst.msk [vmem:[%s573_s28 + $0x18] sm:$0xff] %vm140_vm1, %v173_v33  ;;  %152 = vst.msk [vmem:[%s573_s28 + $0x8] sm:$0xff] %vm140_vm1, %v151_v35 }
  0x98   : > { %v193_v38 = vpop.permute.xlu1 %192  ;;  %v182_v40 = vpop.permute.xlu0 %181 }
  0x99   : > { %v195_v39 = vsel %vm138_vm0, %v186_v36, %v193_v38  ;;  %v184_v41 = vsel %vm138_vm0, %v175_v37, %v182_v40 }
  0x9a   : > { %196 = vst.msk [vmem:[%s573_s28 + $0x28] sm:$0xff] %vm140_vm1, %v195_v39  ;;  %185 = vst.msk [vmem:[%s573_s28 + $0x20] sm:$0xff] %vm140_vm1, %v184_v41 }
  0x9c   : > { %v215_v44 = vpop.permute.xlu1 %214  ;;  %v204_v46 = vpop.permute.xlu0 %203 }
  0x9d   : > { %v217_v45 = vsel %vm138_vm0, %v208_v42, %v215_v44  ;;  %v206_v47 = vsel %vm138_vm0, %v197_v43, %v204_v46 }
  0x9e   : > { %218 = vst.msk [vmem:[%s573_s28 + $0x38] sm:$0xff] %vm140_vm1, %v217_v45  ;;  %207 = vst.msk [vmem:[%s573_s28 + $0x30] sm:$0xff] %vm140_vm1, %v206_v47 }
  0x9f   : > { %408 = shalt.err (!%p405_p5)
}
  0xa0   : > { %s409_s17 = scalar_lea.hbm %s603_s4, 1024  ;;  %s413_s22 = scalar_lea.hbm %s662_s1, 2048 }
  0xa1   : > { %p410_p6 = scmp.ne.s32.totalorder %s603_s4, %s409_s17  ;;  %p414_p10 = scmp.lt.u32.totalorder %s603_s4, %s662_s1 }
  0xa2   : > { %p415_p11 = scmp.lt.u32.totalorder %s413_s22, %s409_s17  ;;  %p417_p13 = scmp.lt.u32.totalorder %s409_s17, %s603_s4 }
  0xa3   : > { %p411_p7 = pnand %p410_p6, %p529_p4 }
  0xa4   : > { %p416_p12 = por %p415_p11, %p414_p10 }
  0xa5   : > { %p412_p9 = pneg %p411_p7 }
  0xa6   : > { %p418_p0 = por %p417_p13, %p416_p12 }
  0xa8   : > { %p419_p1 = pnand %p418_p0, %p412_p9 }
  0xaa   : > { %422 = shalt.err (!%p419_p1)
}
  0xab   : > { %s477_s25 = smov 128   ;;  %s478_s26 = smov 8  }
  0xac   : > { %337 = dma.vmem_to_hbm [thread:$0]  (%p529_p4), %s605_s30, 1024, %s603_s4, %s615_s5, %s477_s25, %s477_s25, %s478_s26  }
  0xad PF: > { %p343_p2 = scmp.ge.s32.totalorder %s473_s11, 2  ;;  %s250_s27 = sand.u32 1, %s453_s6  }
  0xae   : > { %s251_s28 = scalar_lea.sflag [#allocation3], %s250_s27 }
  0xaf   : > { %p340_p3 = pnand %p343_p2, %p536_p8 }
  0xb1   : > { %448 = dma.done.wait (!%p340_p3), %s251_s28, 1024  }
  0xb2   : > { %450 = vsyncadd (!%p340_p3), %s251_s28, 4294966272  ;;  %s14_s11 = sadd.s32 1, %s473_s11   ;;  %s665_s6 = smov %s457_s7 }
  0xb3   : > { %p11_p5 = scmp.ge.s32.totalorder %s14_s11, 4   ;;  %s666_s7 = smov %s461_s8 }
  0xb4   : > { %s667_s8 = smov %s542_s19  ;;  %s668_s9 = smov %s469_s10 }
  0xb5   : > { %s669_s10 = smov %s671_s14  ;;  %13 = sbr.rel (!%p11_p5) target bundleno = 4 (0x4), region = 66 }
  0xbc   :  { %256 = vsyncpa [#allocation3], 1 }
  0xbd   :  { %258 = vsyncpa [#allocation3 + $0x1], 1 }

</bundles_post_ra>
